<compile_context>
chip_gen: v7x
topology: tpu7x:2x2x1
jax: 0.10.0
libtpu: 0.0.40
codegen_flags: <defaults>
</compile_context>

<pallas_src>
import functools

import jax
import jax.numpy as jnp
from jax.experimental import pallas as pl
from jax.experimental.pallas import tpu as pltpu


HIDDEN = 256
_VMEM_PHYS_MIN = 64 * 1024 * 1024      # v7x has the smallest VMEM (64 MiB/TC)
_VMEM_DEFAULT_SCOPED = 16 * 1024 * 1024


# ----------------------------- Pallas kernel ------------------------------ #

def _gcn_fused_kernel(a_ref, x_ref,
                      w1_ref, b1_ref,
                      w2_ref, b2_ref,
                      w3_ref, b3_ref,
                      o_ref, h_ref):
    """Fused 3-layer GCN forward (eval mode).

      h1  = relu((A @ x) @ W1 + b1)       # layer 1 reassociated (Fin << 256)
      h2  = relu(A @ (h1 @ W2) + b2)
      out =       A @ (h2 @ W3) + b3

    All matmuls use bf16 operands on the MXU with f32 accumulation; bias add
    and ReLU ride on the VPU in f32. The activation h stays resident in a
    bf16 VMEM scratch between layers (never leaves the chip).
    """
    a = a_ref[...]                                                   # [Np, Np] bf16

    # ---- layer 1: (A @ x) @ W1 + b1, ReLU ----
    ax = jnp.dot(a, x_ref[...], preferred_element_type=jnp.float32)  # [Np, Fin]
    h = jnp.dot(ax.astype(jnp.bfloat16), w1_ref[...],
                preferred_element_type=jnp.float32)                  # [Np, H]
    h = jnp.maximum(h + b1_ref[...], 0.0)
    h_ref[...] = h.astype(jnp.bfloat16)                              # keep h in VMEM

    # ---- layer 2: A @ (h @ W2) + b2, ReLU ----
    hw = jnp.dot(h_ref[...], w2_ref[...], preferred_element_type=jnp.float32)
    h = jnp.dot(a, hw.astype(jnp.bfloat16), preferred_element_type=jnp.float32)
    h = jnp.maximum(h + b2_ref[...], 0.0)
    h_ref[...] = h.astype(jnp.bfloat16)

    # ---- layer 3: A @ (h @ W3) + b3 (no ReLU) ----
    hw = jnp.dot(h_ref[...], w3_ref[...], preferred_element_type=jnp.float32)
    out = jnp.dot(a, hw.astype(jnp.bfloat16), preferred_element_type=jnp.float32)
    o_ref[...] = (out + b3_ref[...]).astype(o_ref.dtype)


def _vmem_bytes_estimate(n_pad, fin):
    """Rough VMEM footprint (inputs/outputs kept whole + scratch), with 2x on
    pipelined operands for double-buffering headroom."""
    a = n_pad * n_pad * 2
    x = n_pad * fin * 2
    w = 3 * HIDDEN * HIDDEN * 2 + 3 * HIDDEN * 4
    out = n_pad * HIDDEN * 4
    h = n_pad * HIDDEN * 2
    return 2 * (a + x + w + out) + h


def _cost_estimate(n_pad, fin):
    flops = 2 * (n_pad * n_pad * fin            # A @ x
                 + n_pad * fin * HIDDEN         # (.) @ W1
                 + 2 * n_pad * HIDDEN * HIDDEN  # h @ W2, h @ W3
                 + 2 * n_pad * n_pad * HIDDEN)  # A @ (.) twice
    bytes_accessed = (n_pad * n_pad * 2 + n_pad * fin * 2
                      + 3 * HIDDEN * HIDDEN * 2 + 3 * HIDDEN * 4
                      + n_pad * HIDDEN * 4)
    return pl.CostEstimate(flops=flops, transcendentals=0,
                           bytes_accessed=bytes_accessed)


def gcn_forward(a_hat_pad, x_pad, params):
    """Single fused pallas_call over the whole (padded) graph.

    At small/medium N everything fits in VMEM on v5e/v6e/v7x, so we use
    full-array blocks (no grid) and keep all operands resident.
    # TODO(synk): for graphs whose dense A_hat does not fit in 64 MiB VMEM
    # (v7x), switch to a (row-tile, K-tile) grid with the intermediate h
    # streamed through HBM between layers, row axis marked "parallel".
    """
    n_pad, fin = x_pad.shape

    needed = _vmem_bytes_estimate(n_pad, fin)
    assert needed <= _VMEM_PHYS_MIN, (
        f"graph too large for the fully-resident fused kernel "
        f"({needed / 2**20:.1f} MiB VMEM needed)")
    compiler_params = None
    if needed > _VMEM_DEFAULT_SCOPED:
        compiler_params = pltpu.CompilerParams(
            vmem_limit_bytes=min(needed + (2 << 20), _VMEM_PHYS_MIN))

    vmem = functools.partial(pl.BlockSpec, memory_space=pltpu.MemorySpace.VMEM)
    return pl.pallas_call(
        _gcn_fused_kernel,
        out_shape=jax.ShapeDtypeStruct((n_pad, HIDDEN), jnp.float32),
        in_specs=[vmem()] * 8,       # a_hat, x, w1, b1, w2, b2, w3, b3
        out_specs=vmem(),
        scratch_shapes=[pltpu.VMEM((n_pad, HIDDEN), jnp.bfloat16)],  # h
        cost_estimate=_cost_estimate(n_pad, fin),
        compiler_params=compiler_params,
    )(a_hat_pad, x_pad,
      params["conv1_w"], params["conv1_b"],
      params["conv2_w"], params["conv2_b"],
      params["conv3_w"], params["conv3_b"])


# ------------------------------- host-side glue ---------------------------- #

def _round_up(n, m):
    return ((n + m - 1) // m) * m


def normalized_adjacency(edge_index, num_nodes):
    """Dense D^-1/2 (A + I) D^-1/2 matching PyG GCNConv gcn_norm.

    * duplicate (parallel) edges are counted (scatter-ADD), as in PyG's
      scatter_add degree computation;
    * self-loops in edge_index are dropped and replaced by exactly one
      weight-1 self loop per node (add_remaining_self_loops semantics);
    * messages flow src -> dst, i.e. out[dst] aggregates x[src].
    """
    src, dst = edge_index[0], edge_index[1]
    w = jnp.where(src != dst, 1.0, 0.0).astype(jnp.float32)
    a = jnp.zeros((num_nodes, num_nodes), jnp.float32)
    a = a.at[dst, src].add(w)                       # parallel edges accumulate
    a = a + jnp.eye(num_nodes, dtype=jnp.float32)   # one self loop per node
    deg = jnp.sum(a, axis=1)                        # target-side degree
    dinv = jnp.where(deg > 0, 1.0 / jnp.sqrt(deg), 0.0)
    return dinv[:, None] * a * dinv[None, :]


def precompute_graph(edge_index, num_nodes, x):
    """Build A_hat once per graph, pad the node axis to a multiple of 16
    (bf16 sublane packing), cast the MXU operands to bf16. Hoisted out of
    the per-forward path."""
    a_hat = normalized_adjacency(edge_index, num_nodes)
    n_pad = _round_up(num_nodes, 16)
    pad_n = n_pad - num_nodes
    # Padded rows/cols of A_hat are zero, so padding never contaminates real
    # nodes; padded output rows are just the bias chain and get sliced off.
    a_pad = jnp.pad(a_hat, ((0, pad_n), (0, pad_n))).astype(jnp.bfloat16)
    x_pad = jnp.pad(x, ((0, pad_n), (0, 0))).astype(jnp.bfloat16)
    return a_pad, x_pad, n_pad


def init_gcn_params(key, num_features, hidden=HIDDEN):
    """Deterministic Glorot-style init. Weights cast to bf16 for the MXU,
    biases kept in f32 (epilogue runs in f32)."""
    ks = jax.random.split(key, 8)

    def glorot(k, fan_in, fan_out):
        lim = jnp.sqrt(6.0 / (fan_in + fan_out))
        return jax.random.uniform(k, (fan_in, fan_out), jnp.float32, -lim, lim)

    params = {
        "conv1_w": glorot(ks[0], num_features, hidden).astype(jnp.bfloat16),
        "conv1_b": jnp.zeros((1, hidden), jnp.float32),
        "conv2_w": glorot(ks[1], hidden, hidden).astype(jnp.bfloat16),
        "conv2_b": jnp.zeros((1, hidden), jnp.float32),
        "conv3_w": glorot(ks[2], hidden, hidden).astype(jnp.bfloat16),
        "conv3_b": jnp.zeros((1, hidden), jnp.float32),
        # scoring head params (used by .decode, not by .forward)
        "lin1_w": glorot(ks[3], 2 * hidden, hidden),
        "lin1_b": jnp.zeros((hidden,), jnp.float32),
        "lin2_w": glorot(ks[4], hidden, 1),
        "lin2_b": jnp.zeros((1,), jnp.float32),
    }
    return params
    # TODO(synk): GCN.decode (edge scoring MLP on gathered node pairs) is a
    # data-dependent gather + small MLP; left in plain JAX / not exercised here.


# --------------------------------- main ------------------------------------ #

if __name__ == "__main__":
    key = jax.random.PRNGKey(0)
    k_feat, k_edge, k_param = jax.random.split(key, 3)

    num_nodes = 16
    num_features = 16
    num_edges = 40

    x = jax.random.normal(k_feat, (num_nodes, num_features), jnp.float32)
    edge_index = jax.random.randint(k_edge, (2, num_edges), 0, num_nodes,
                                    dtype=jnp.int32)

    params = init_gcn_params(k_param, num_features)

    # Graph preprocessing hoisted out of the forward path (built once).
    a_hat_pad, x_pad, n_pad = precompute_graph(edge_index, num_nodes, x)

    forward = jax.jit(gcn_forward)
    out_pad = forward(a_hat_pad, x_pad, params)
    out_pad = jax.block_until_ready(out_pad)
    out = out_pad[:num_nodes]                       # drop padded nodes

    assert out.shape == (num_nodes, HIDDEN)
    assert jnp.all(jnp.isfinite(out))
    print("KERNEL_OK")
</pallas_src>

<mosaic_0001>
module attributes {stable_mosaic.version = 11 : i64} {
  func.func @_gcn_fused_kernel(%arg0: memref<16x16xbf16, #tpu.memory_space<vmem>>, %arg1: memref<16x16xbf16, #tpu.memory_space<vmem>>, %arg2: memref<16x256xbf16, #tpu.memory_space<vmem>>, %arg3: memref<1x256xf32, #tpu.memory_space<vmem>>, %arg4: memref<256x256xbf16, #tpu.memory_space<vmem>>, %arg5: memref<1x256xf32, #tpu.memory_space<vmem>>, %arg6: memref<256x256xbf16, #tpu.memory_space<vmem>>, %arg7: memref<1x256xf32, #tpu.memory_space<vmem>>, %arg8: memref<16x256xf32, #tpu.memory_space<vmem>>, %arg9: memref<16x256xbf16, #tpu.memory_space<vmem>>) attributes {dimension_semantics = [], scalar_prefetch = 0 : i64, scratch_operands = 1 : i64, tpu.core_type = #tpu.core_type<tc>} {
    %c0 = arith.constant 0 : index
    %c0_0 = arith.constant 0 : index
    %0 = vector.load %arg0[%c0, %c0_0] : memref<16x16xbf16, #tpu.memory_space<vmem>>, vector<16x16xbf16>
    %c0_1 = arith.constant 0 : index
    %c0_2 = arith.constant 0 : index
    %1 = vector.load %arg1[%c0_1, %c0_2] : memref<16x16xbf16, #tpu.memory_space<vmem>>, vector<16x16xbf16>
    %cst = arith.constant dense<0.000000e+00> : vector<16x16xf32>
    %2 = tpu.matmul %0, %1, %cst {dimension_numbers = #tpu.dot_dimension_numbers<[1], [0], [0], [1], [0, 0, 1, 1], [], []>} : vector<16x16xbf16>, vector<16x16xbf16>, vector<16x16xf32> -> vector<16x16xf32>
    %3 = arith.truncf %2 : vector<16x16xf32> to vector<16x16xbf16>
    %c0_3 = arith.constant 0 : index
    %c0_4 = arith.constant 0 : index
    %4 = vector.load %arg2[%c0_3, %c0_4] : memref<16x256xbf16, #tpu.memory_space<vmem>>, vector<16x256xbf16>
    %cst_5 = arith.constant dense<0.000000e+00> : vector<16x256xf32>
    %5 = tpu.matmul %3, %4, %cst_5 {dimension_numbers = #tpu.dot_dimension_numbers<[1], [0], [0], [1], [0, 0, 1, 1], [], []>} : vector<16x16xbf16>, vector<16x256xbf16>, vector<16x256xf32> -> vector<16x256xf32>
    %c0_6 = arith.constant 0 : index
    %c0_7 = arith.constant 0 : index
    %6 = vector.load %arg3[%c0_6, %c0_7] : memref<1x256xf32, #tpu.memory_space<vmem>>, vector<1x256xf32>
    %7 = vector.broadcast %6 : vector<1x256xf32> to vector<16x256xf32>
    %8 = arith.addf %5, %7 : vector<16x256xf32>
    %cst_8 = arith.constant 0.000000e+00 : f32
    %9 = vector.broadcast %cst_8 : f32 to vector<16x256xf32>
    %10 = arith.maximumf %8, %9 : vector<16x256xf32>
    %11 = arith.truncf %10 : vector<16x256xf32> to vector<16x256xbf16>
    %c0_9 = arith.constant 0 : index
    %c0_10 = arith.constant 0 : index
    %12 = vector.load %arg9[%c0_9, %c0_10] : memref<16x256xbf16, #tpu.memory_space<vmem>>, vector<16x256xbf16>
    tpu.vector_store %arg9[%c0_9, %c0_10], %11 {strides = array<i32>} : memref<16x256xbf16, #tpu.memory_space<vmem>>, vector<16x256xbf16>,
    %c0_11 = arith.constant 0 : index
    %c0_12 = arith.constant 0 : index
    %13 = vector.load %arg9[%c0_11, %c0_12] : memref<16x256xbf16, #tpu.memory_space<vmem>>, vector<16x256xbf16>
    %c0_13 = arith.constant 0 : index
    %c0_14 = arith.constant 0 : index
    %14 = vector.load %arg4[%c0_13, %c0_14] : memref<256x256xbf16, #tpu.memory_space<vmem>>, vector<256x256xbf16>
    %cst_15 = arith.constant dense<0.000000e+00> : vector<16x256xf32>
    %15 = tpu.matmul %13, %14, %cst_15 {dimension_numbers = #tpu.dot_dimension_numbers<[1], [0], [0], [1], [0, 0, 1, 1], [], []>} : vector<16x256xbf16>, vector<256x256xbf16>, vector<16x256xf32> -> vector<16x256xf32>
    %16 = arith.truncf %15 : vector<16x256xf32> to vector<16x256xbf16>
    %cst_16 = arith.constant dense<0.000000e+00> : vector<16x256xf32>
    %17 = tpu.matmul %0, %16, %cst_16 {dimension_numbers = #tpu.dot_dimension_numbers<[1], [0], [0], [1], [0, 0, 1, 1], [], []>} : vector<16x16xbf16>, vector<16x256xbf16>, vector<16x256xf32> -> vector<16x256xf32>
    %c0_17 = arith.constant 0 : index
    %c0_18 = arith.constant 0 : index
    %18 = vector.load %arg5[%c0_17, %c0_18] : memref<1x256xf32, #tpu.memory_space<vmem>>, vector<1x256xf32>
    %19 = vector.broadcast %18 : vector<1x256xf32> to vector<16x256xf32>
    %20 = arith.addf %17, %19 : vector<16x256xf32>
    %cst_19 = arith.constant 0.000000e+00 : f32
    %21 = vector.broadcast %cst_19 : f32 to vector<16x256xf32>
    %22 = arith.maximumf %20, %21 : vector<16x256xf32>
    %23 = arith.truncf %22 : vector<16x256xf32> to vector<16x256xbf16>
    %c0_20 = arith.constant 0 : index
    %c0_21 = arith.constant 0 : index
    %24 = vector.load %arg9[%c0_20, %c0_21] : memref<16x256xbf16, #tpu.memory_space<vmem>>, vector<16x256xbf16>
    tpu.vector_store %arg9[%c0_20, %c0_21], %23 {strides = array<i32>} : memref<16x256xbf16, #tpu.memory_space<vmem>>, vector<16x256xbf16>,
    %c0_22 = arith.constant 0 : index
    %c0_23 = arith.constant 0 : index
    %25 = vector.load %arg9[%c0_22, %c0_23] : memref<16x256xbf16, #tpu.memory_space<vmem>>, vector<16x256xbf16>
    %c0_24 = arith.constant 0 : index
    %c0_25 = arith.constant 0 : index
    %26 = vector.load %arg6[%c0_24, %c0_25] : memref<256x256xbf16, #tpu.memory_space<vmem>>, vector<256x256xbf16>
    %cst_26 = arith.constant dense<0.000000e+00> : vector<16x256xf32>
    %27 = tpu.matmul %25, %26, %cst_26 {dimension_numbers = #tpu.dot_dimension_numbers<[1], [0], [0], [1], [0, 0, 1, 1], [], []>} : vector<16x256xbf16>, vector<256x256xbf16>, vector<16x256xf32> -> vector<16x256xf32>
    %28 = arith.truncf %27 : vector<16x256xf32> to vector<16x256xbf16>
    %cst_27 = arith.constant dense<0.000000e+00> : vector<16x256xf32>
    %29 = tpu.matmul %0, %28, %cst_27 {dimension_numbers = #tpu.dot_dimension_numbers<[1], [0], [0], [1], [0, 0, 1, 1], [], []>} : vector<16x16xbf16>, vector<16x256xbf16>, vector<16x256xf32> -> vector<16x256xf32>
    %c0_28 = arith.constant 0 : index
    %c0_29 = arith.constant 0 : index
    %30 = vector.load %arg7[%c0_28, %c0_29] : memref<1x256xf32, #tpu.memory_space<vmem>>, vector<1x256xf32>
    %31 = vector.broadcast %30 : vector<1x256xf32> to vector<16x256xf32>
    %32 = arith.addf %29, %31 : vector<16x256xf32>
    %c0_30 = arith.constant 0 : index
    %c0_31 = arith.constant 0 : index
    %33 = vector.load %arg8[%c0_30, %c0_31] : memref<16x256xf32, #tpu.memory_space<vmem>>, vector<16x256xf32>
    tpu.vector_store %arg8[%c0_30, %c0_31], %32 {strides = array<i32>} : memref<16x256xf32, #tpu.memory_space<vmem>>, vector<16x256xf32>,
    return
  }
}

</mosaic_0001>

<bundles_post_ra>
// kernel: gcn_forward.1
= control target key start
LH: loop header
LB: loop body
LE: loop exit
PB: predicated region body
PF: predicated region fallthrough
CT: control target
= control target key end

     0   :  { %13 = vsyncpa [#allocation4], 0  ;;  %s1371_s0 = inlined_call_operand.hbm [shape: bf16[16,16], index: 0, kind: input, shape index: {}]   ;;  %s1372_s1 = inlined_call_operand.hbm [shape: bf16[16,16], index: 1, kind: input, shape index: {}]   ;;  %s1373_s2 = inlined_call_operand.hbm [shape: bf16[16,256], index: 2, kind: input, shape index: {}]   ;;  %s1374_s3 = inlined_call_operand.vmem [shape: f32[1,256], index: 3, kind: input, shape index: {}]   ;;  %s1375_s4 = inlined_call_operand.hbm [shape: bf16[256,256], index: 4, kind: input, shape index: {}]   ;;  %s1376_s5 = inlined_call_operand.vmem [shape: f32[1,256], index: 5, kind: input, shape index: {}]   ;;  %s1377_s6 = inlined_call_operand.hbm [shape: bf16[256,256], index: 6, kind: input, shape index: {}]   ;;  %s1378_s7 = inlined_call_operand.vmem [shape: f32[1,256], index: 7, kind: input, shape index: {}]   ;;  %s1379_s8 = inlined_call_operand.hbm [shape: f32[16,256], index: 8, kind: output, shape index: {}]  }
   0x1   :  { %14 = vsyncpa [#allocation7], 0 }
   0x2   :  { %15 = vsyncpa [#allocation10], 0 }
   0x3   :  { %16 = vsyncpa [#allocation5], 0  ;;  %s1193_s27 = smov [#allocation6]   ;;  %s1053_s9 = scalar_lea.hbm %s1372_s1, 128 }
   0x4   :  { %s34_s28 = sshll.u32 %s1193_s27, 4  ;;  %p1054_p0 = scmp.ne.s32.totalorder %s1372_s1, %s1053_s9  ;;  %s35_s28 = int_to_ptr.vmem [resolvable:$true] %s34_s28 }
   0x5   :  { %p1057_p1 = scmp.lt.u32.totalorder %s1053_s9, %s1372_s1 }
   0x7   :  { %p1059_p2 = pnand %p1057_p1, %p1054_p0 }
   0x9   :  { %1062 = shalt.err (!%p1059_p2)
}
   0xa   :  { %s1063_s14 = scalar_lea.vmem %s35_s28, 128  ;;  %p1068_p4 = scmp.lt.s32.totalorder %s35_s28, %s35_s28 }
   0xb   :  { %p1064_p3 = scmp.ne.s32.totalorder %s35_s28, %s1063_s14  ;;  %p1069_p5 = scmp.lt.s32.totalorder %s1063_s14, %s1063_s14 }
   0xd   :  { %p1070_p6 = por %p1069_p5, %p1068_p4 }
   0xf   :  { %p1071_p7 = pnand %p1070_p6, %p1064_p3 }
  0x11   :  { %1074 = shalt.err (!%p1071_p7)
}
  0x12   :  { %s1194_s15 = smov 64   ;;  %s1195_s16 = smov 4  }
  0x13   :  { %40 = dma.hbm_to_vmem [thread:$0]  %s1372_s1, 128, %s35_s28, [#allocation7], %s1194_s15, %s1194_s15, %s1195_s16  }
  0x14   :  { %s1196_s19 = smov [#allocation9]   ;;  %s1197_s21 = smov [#allocation3]  }
  0x15   :  { %s60_s20 = sshll.u32 %s1196_s19, 4  ;;  %s22_s22 = sshll.u32 %s1197_s21, 4  ;;  %s61_s20 = int_to_ptr.vmem [resolvable:$true] %s60_s20  ;;  %s23_s22 = int_to_ptr.vmem [resolvable:$true] %s22_s22 }
  0x16   :  { %s1075_s25 = scalar_lea.hbm %s1375_s4, 4096 }
  0x17   :  { %p1076_p8 = scmp.ne.s32.totalorder %s1375_s4, %s1075_s25  ;;  %p1079_p9 = scmp.lt.u32.totalorder %s1075_s25, %s1375_s4 }
  0x19   :  { %p1081_p10 = pnand %p1079_p9, %p1076_p8 }
  0x1b   :  { %1084 = shalt.err (!%p1081_p10)
}
  0x1c   :  { %s1085_s1 = scalar_lea.vmem %s61_s20, 4096  ;;  %p1090_p12 = scmp.lt.s32.totalorder %s61_s20, %s61_s20 }
  0x1d   :  { %p1086_p11 = scmp.ne.s32.totalorder %s61_s20, %s1085_s1  ;;  %p1091_p13 = scmp.lt.s32.totalorder %s1085_s1, %s1085_s1 }
  0x1f   :  { %p1092_p0 = por %p1091_p13, %p1090_p12 }
  0x21   :  { %p1093_p1 = pnand %p1092_p0, %p1086_p11 }
  0x23   :  { %1096 = shalt.err (!%p1093_p1)
}
  0x24   :  { %s1198_s28 = smov 128   ;;  %s1199_s9 = smov 8  }
  0x25   :  { %66 = dma.hbm_to_vmem [thread:$0]  %s1375_s4, 4096, %s61_s20, [#allocation10], %s1198_s28, %s1198_s28, %s1199_s9  }
  0x26   :  { %s1097_s14 = scalar_lea.hbm %s1371_s0, 128 }
  0x27   :  { %p1098_p2 = scmp.ne.s32.totalorder %s1371_s0, %s1097_s14  ;;  %p1101_p3 = scmp.lt.u32.totalorder %s1097_s14, %s1371_s0 }
  0x29   :  { %p1103_p4 = pnand %p1101_p3, %p1098_p2 }
  0x2b   :  { %1106 = shalt.err (!%p1103_p4)
}
  0x2c   :  { %s1107_s23 = scalar_lea.vmem %s23_s22, 128  ;;  %p1112_p6 = scmp.lt.s32.totalorder %s23_s22, %s23_s22 }
  0x2d   :  { %p1108_p5 = scmp.ne.s32.totalorder %s23_s22, %s1107_s23  ;;  %p1113_p7 = scmp.lt.s32.totalorder %s1107_s23, %s1107_s23 }
  0x2f   :  { %p1114_p8 = por %p1113_p7, %p1112_p6 }
  0x31   :  { %p1115_p9 = pnand %p1114_p8, %p1108_p5 }
  0x33   :  { %1118 = shalt.err (!%p1115_p9)
}
  0x34   :  { %28 = dma.hbm_to_vmem [thread:$0]  %s1371_s0, 128, %s23_s22, [#allocation4], %s1194_s15, %s1194_s15, %s1195_s16  }
  0x35   :  { %s1200_s24 = smov [#allocation8]   ;;  %s1201_s26 = smov [#allocation11]  }
  0x36   :  { %s46_s25 = sshll.u32 %s1200_s24, 4  ;;  %s74_s27 = sshll.u32 %s1201_s26, 4  ;;  %s47_s25 = int_to_ptr.vmem [resolvable:$true] %s46_s25  ;;  %s75_s27 = int_to_ptr.vmem [resolvable:$true] %s74_s27 }
  0x37   :  { %s1119_s1 = scalar_lea.hbm %s1373_s2, 256 }
  0x38   :  { %p1120_p10 = scmp.ne.s32.totalorder %s1373_s2, %s1119_s1  ;;  %p1123_p11 = scmp.lt.u32.totalorder %s1119_s1, %s1373_s2 }
  0x3a   :  { %p1125_p12 = pnand %p1123_p11, %p1120_p10 }
  0x3c   :  { %1128 = shalt.err (!%p1125_p12)
}
  0x3d   :  { %s1129_s0 = scalar_lea.vmem %s47_s25, 256  ;;  %p1134_p0 = scmp.lt.s32.totalorder %s47_s25, %s47_s25 }
  0x3e   :  { %p1130_p13 = scmp.ne.s32.totalorder %s47_s25, %s1129_s0  ;;  %p1135_p1 = scmp.lt.s32.totalorder %s1129_s0, %s1129_s0 }
  0x40   :  { %p1136_p2 = por %p1135_p1, %p1134_p0 }
  0x42   :  { %p1137_p3 = pnand %p1136_p2, %p1130_p13 }
  0x44   :  { %1140 = shalt.err (!%p1137_p3)
}
  0x45   :  { %52 = dma.hbm_to_vmem [thread:$0]  %s1373_s2, 256, %s47_s25, [#allocation7], %s1198_s28, %s1198_s28, %s1199_s9  }
  0x46   :  { %s1141_s17 = scalar_lea.hbm %s1377_s6, 4096 }
  0x47   :  { %p1142_p4 = scmp.ne.s32.totalorder %s1377_s6, %s1141_s17  ;;  %p1145_p5 = scmp.lt.u32.totalorder %s1141_s17, %s1377_s6 }
  0x49   :  { %p1147_p6 = pnand %p1145_p5, %p1142_p4 }
  0x4b   :  { %1150 = shalt.err (!%p1147_p6)
}
  0x4c   :  { %s1151_s4 = scalar_lea.vmem %s75_s27, 4096  ;;  %p1156_p8 = scmp.lt.s32.totalorder %s75_s27, %s75_s27 }
  0x4d   :  { %p1152_p7 = scmp.ne.s32.totalorder %s75_s27, %s1151_s4  ;;  %p1157_p9 = scmp.lt.s32.totalorder %s1151_s4, %s1151_s4 }
  0x4f   :  { %p1158_p10 = por %p1157_p9, %p1156_p8 }
  0x51   :  { %p1159_p11 = pnand %p1158_p10, %p1152_p7 }
  0x53   :  { %1162 = shalt.err (!%p1159_p11)
}
  0x54   :  { %80 = dma.hbm_to_vmem [thread:$0]  %s1377_s6, 4096, %s75_s27, [#allocation10], %s1198_s28, %s1198_s28, %s1199_s9  }
  0x55   :  { %1185 = dma.done.wait [#allocation4], 128  }
  0x56   :  { %1186 = vsyncadd [#allocation4], 4294967168 }
  0x57   :  { %1187 = dma.done.wait [#allocation7], 384  }
  0x58   :  { %1188 = vsyncadd [#allocation7], 4294966912 }
  0x59   :  { %1189 = dma.done.wait [#allocation10], 8192  }
  0x5a   :  { %1190 = vsyncadd [#allocation10], 4294959104  ;;  %v1202_v0 = vmov 0.0   ;;  %vm1203_vm0 = vmmov 0   ;;  %v952_v1 = vld [vmem:[#allocation6] sm:$0xff]   ;;  %v1328_v2 = vld [vmem:[#allocation3] sm:$0xff]   ;;  %v164_v43 = vlaneseq }
  0x5b   :  { %931 = vmatprep.subr.bf16.mxu0 %v1202_v0  ;;  %933 = vmatprep.mubr.msk.bf16.mxu0 %vm1203_vm0, %v1202_v0  ;;  %vm114_vm1 = vcmask 130048   ;;  %v954_v3 = vld [vmem:[#allocation8 + $0x4] ss:$8 sps:$4 sm:$0xff]   ;;  %v956_v4 = vld [vmem:[#allocation8] ss:$8 sps:$4 sm:$0xff]   ;;  %v1204_v5 = vmov 0  }
  0x5c   :  { %932 = vmatpush3.bf16.msra.mxu0 %v952_v1  ;;  %187 = vmatprep.subr.bf16.mxu1 %v954_v3  ;;  %v957_v6 = vld [vmem:[#allocation9] ss:$8 sps:$4 sm:$0xff]   ;;  %v959_v7 = vld [vmem:[#allocation9 + $0x4] ss:$8 sps:$4 sm:$0xff]   ;;  %v962_v8 = vld [vmem:[#allocation9 + $0x14] ss:$8 sps:$4 sm:$0xff]  }
  0x5d   :  { %188 = vmatpush1.bf16.msra.mxu1 %v956_v4  ;;  %219 = vmatprep.mubr.bf16.mxu1 %v1204_v5  ;;  %v960_v9 = vld [vmem:[#allocation9 + $0x10] ss:$8 sps:$4 sm:$0xff]   ;;  %v965_v10 = vld [vmem:[#allocation9 + $0x24] ss:$8 sps:$4 sm:$0xff]   ;;  %v963_v11 = vld [vmem:[#allocation9 + $0x20] ss:$8 sps:$4 sm:$0xff]  }
  0x5e   :  { %432 = vmatprep.subr.bf16.mxu0 %v959_v7  ;;  %v968_v12 = vld [vmem:[#allocation9 + $0x34] ss:$8 sps:$4 sm:$0xff]   ;;  %v966_v13 = vld [vmem:[#allocation9 + $0x30] ss:$8 sps:$4 sm:$0xff]   ;;  %v971_v14 = vld [vmem:[#allocation9 + $0x44] ss:$8 sps:$4 sm:$0xff]  }
  0x5f   :  { %934 = vmatmul.mubr.msk.bf16.vlgmr.msra.gmra.mrb[0].mxu0 %vm114_vm1, %v1328_v2  ;;  %v969_v15 = vld [vmem:[#allocation9 + $0x40] ss:$8 sps:$4 sm:$0xff]   ;;  %v974_v16 = vld [vmem:[#allocation9 + $0x54] ss:$8 sps:$4 sm:$0xff]   ;;  %v972_v17 = vld [vmem:[#allocation9 + $0x50] ss:$8 sps:$4 sm:$0xff]  }
  0x60   :  { %433 = vmatpush1.bf16.msra.mxu0 %v957_v6  ;;  %v977_v18 = vld [vmem:[#allocation9 + $0x64] ss:$8 sps:$4 sm:$0xff]   ;;  %v975_v19 = vld [vmem:[#allocation9 + $0x60] ss:$8 sps:$4 sm:$0xff]   ;;  %v980_v20 = vld [vmem:[#allocation9 + $0x74] ss:$8 sps:$4 sm:$0xff]  }
  0x61   :  { %434 = vmatprep.subr.bf16.mxu0 %v962_v8  ;;  %v978_v21 = vld [vmem:[#allocation9 + $0x70] ss:$8 sps:$4 sm:$0xff]   ;;  %v983_v22 = vld [vmem:[#allocation9 + $0x84] ss:$8 sps:$4 sm:$0xff]   ;;  %v981_v23 = vld [vmem:[#allocation9 + $0x80] ss:$8 sps:$4 sm:$0xff]  }
  0x62   :  { %v986_v24 = vld [vmem:[#allocation9 + $0x94] ss:$8 sps:$4 sm:$0xff]   ;;  %v984_v25 = vld [vmem:[#allocation9 + $0x90] ss:$8 sps:$4 sm:$0xff]   ;;  %v989_v26 = vld [vmem:[#allocation9 + $0xa4] ss:$8 sps:$4 sm:$0xff]  }
  0x63   :  { %v987_v27 = vld [vmem:[#allocation9 + $0xa0] ss:$8 sps:$4 sm:$0xff]   ;;  %v992_v28 = vld [vmem:[#allocation9 + $0xb4] ss:$8 sps:$4 sm:$0xff]   ;;  %v990_v29 = vld [vmem:[#allocation9 + $0xb0] ss:$8 sps:$4 sm:$0xff]  }
  0x64   :  { %435 = vmatpush1.bf16.msra.mxu0 %v960_v9  ;;  %v995_v30 = vld [vmem:[#allocation9 + $0xc4] ss:$8 sps:$4 sm:$0xff]   ;;  %v993_v31 = vld [vmem:[#allocation9 + $0xc0] ss:$8 sps:$4 sm:$0xff]   ;;  %v998_v32 = vld [vmem:[#allocation9 + $0xd4] ss:$8 sps:$4 sm:$0xff]  }
  0x65   :  { %436 = vmatprep.subr.bf16.mxu0 %v965_v10  ;;  %v996_v33 = vld [vmem:[#allocation9 + $0xd0] ss:$8 sps:$4 sm:$0xff]   ;;  %v1001_v39 = vld [vmem:[#allocation9 + $0xe4] ss:$8 sps:$4 sm:$0xff]   ;;  %v999_v40 = vld [vmem:[#allocation9 + $0xe0] ss:$8 sps:$4 sm:$0xff]  }
  0x66   :  { %v1004_v41 = vld [vmem:[#allocation9 + $0xf4] ss:$8 sps:$4 sm:$0xff]   ;;  %v1002_v42 = vld [vmem:[#allocation9 + $0xf0] ss:$8 sps:$4 sm:$0xff]   ;;  %v165_v44 = vshrl.u32 %v164_v43, 7  ;;  %s1205_s25 = smov [#allocation12]  }
  0x67   :  { %v162_v46 = vld [vmem:[%s1374_s3] sm:$0x3]  ;;  %v1007_v8 = vld [vmem:[#allocation11 + $0x4] ss:$8 sps:$4 sm:$0xff]   ;;  %v1010_v10 = vld [vmem:[#allocation11 + $0x14] ss:$8 sps:$4 sm:$0xff]  }
  0x68   :  { %437 = vmatpush1.bf16.msra.mxu0 %v963_v11  ;;  %v1335_v45 = vsub.s32 0, %v165_v44  ;;  %v1340_v47 = vsub.s32 1, %v165_v44  ;;  %v1005_v9 = vld [vmem:[#allocation11] ss:$8 sps:$4 sm:$0xff]   ;;  %v1008_v11 = vld [vmem:[#allocation11 + $0x10] ss:$8 sps:$4 sm:$0xff]  }
  0x69   :  { %438 = vmatprep.subr.bf16.mxu0 %v968_v12  ;;  %v1013_v12 = vld [vmem:[#allocation11 + $0x24] ss:$8 sps:$4 sm:$0xff]   ;;  %s843_s26 = sshll.u32 %s1205_s25, 4  ;;  %s844_s26 = int_to_ptr.vmem [resolvable:$true] %s843_s26 }
  0x6a   :  { %v167_v48 = vrot.slane %v162_v46, %v1335_v45  ;;  %v171_v49 = vrot.slane %v162_v46, %v1340_v47  ;;  %p1168_p13 = scmp.lt.s32.totalorder %s844_s26, %s844_s26 }
  0x6c   :  { %439 = vmatpush1.bf16.msra.mxu0 %v966_v13  ;;  %v1016_v13 = vld [vmem:[#allocation11 + $0x34] ss:$8 sps:$4 sm:$0xff]  }
  0x6d   :  { %440 = vmatprep.subr.bf16.mxu0 %v971_v14  ;;  %v1014_v14 = vld [vmem:[#allocation11 + $0x30] ss:$8 sps:$4 sm:$0xff]  }
  0x70   :  { %441 = vmatpush1.bf16.msra.mxu0 %v969_v15  ;;  %v1019_v15 = vld [vmem:[#allocation11 + $0x44] ss:$8 sps:$4 sm:$0xff]  }
  0x71   :  { %442 = vmatprep.subr.bf16.mxu0 %v974_v16  ;;  %v1017_v16 = vld [vmem:[#allocation11 + $0x40] ss:$8 sps:$4 sm:$0xff]  }
  0x74   :  { %443 = vmatpush1.bf16.msra.mxu0 %v972_v17  ;;  %v1022_v17 = vld [vmem:[#allocation11 + $0x54] ss:$8 sps:$4 sm:$0xff]  }
  0x75   :  { %444 = vmatprep.subr.bf16.mxu0 %v977_v18  ;;  %v1020_v18 = vld [vmem:[#allocation11 + $0x50] ss:$8 sps:$4 sm:$0xff]  }
  0x78   :  { %445 = vmatpush1.bf16.msra.mxu0 %v975_v19  ;;  %v1025_v19 = vld [vmem:[#allocation11 + $0x64] ss:$8 sps:$4 sm:$0xff]  }
  0x79   :  { %446 = vmatprep.subr.bf16.mxu0 %v980_v20  ;;  %v1023_v20 = vld [vmem:[#allocation11 + $0x60] ss:$8 sps:$4 sm:$0xff]  }
  0x7c   :  { %447 = vmatpush1.bf16.msra.mxu0 %v978_v21  ;;  %v1028_v21 = vld [vmem:[#allocation11 + $0x74] ss:$8 sps:$4 sm:$0xff]  }
  0x7d   :  { %448 = vmatprep.subr.bf16.mxu0 %v983_v22  ;;  %v1026_v22 = vld [vmem:[#allocation11 + $0x70] ss:$8 sps:$4 sm:$0xff]  }
  0x80   :  { %449 = vmatpush1.bf16.msra.mxu0 %v981_v23  ;;  %v1031_v23 = vld [vmem:[#allocation11 + $0x84] ss:$8 sps:$4 sm:$0xff]  }
  0x81   :  { %450 = vmatprep.subr.bf16.mxu0 %v986_v24  ;;  %v1029_v24 = vld [vmem:[#allocation11 + $0x80] ss:$8 sps:$4 sm:$0xff]  }
  0x84   :  { %451 = vmatpush1.bf16.msra.mxu0 %v984_v25  ;;  %v1034_v25 = vld [vmem:[#allocation11 + $0x94] ss:$8 sps:$4 sm:$0xff]  }
  0x85   :  { %452 = vmatprep.subr.bf16.mxu0 %v989_v26  ;;  %v1032_v26 = vld [vmem:[#allocation11 + $0x90] ss:$8 sps:$4 sm:$0xff]  }
  0x88   :  { %453 = vmatpush1.bf16.msra.mxu0 %v987_v27  ;;  %v1037_v27 = vld [vmem:[#allocation11 + $0xa4] ss:$8 sps:$4 sm:$0xff]  }
  0x89   :  { %454 = vmatprep.subr.bf16.mxu0 %v992_v28  ;;  %v1035_v28 = vld [vmem:[#allocation11 + $0xa0] ss:$8 sps:$4 sm:$0xff]  }
  0x8c   :  { %455 = vmatpush1.bf16.msra.mxu0 %v990_v29  ;;  %v1040_v29 = vld [vmem:[#allocation11 + $0xb4] ss:$8 sps:$4 sm:$0xff]  }
  0x8d   :  { %456 = vmatprep.subr.bf16.mxu0 %v995_v30  ;;  %v1038_v30 = vld [vmem:[#allocation11 + $0xb0] ss:$8 sps:$4 sm:$0xff]  }
  0x90   :  { %457 = vmatpush1.bf16.msra.mxu0 %v993_v31  ;;  %v1043_v31 = vld [vmem:[#allocation11 + $0xc4] ss:$8 sps:$4 sm:$0xff]  }
  0x91   :  { %458 = vmatprep.subr.bf16.mxu0 %v998_v32  ;;  %v1041_v32 = vld [vmem:[#allocation11 + $0xc0] ss:$8 sps:$4 sm:$0xff]  }
  0x94   :  { %459 = vmatpush1.bf16.msra.mxu0 %v996_v33  ;;  %v1046_v33 = vld [vmem:[#allocation11 + $0xd4] ss:$8 sps:$4 sm:$0xff]  }
  0x95   :  { %460 = vmatprep.subr.bf16.mxu0 %v1001_v39  ;;  %v477_v39 = vld [vmem:[%s1376_s5] sm:$0x3] }
  0x98   :  { %461 = vmatpush1.bf16.msra.mxu0 %v999_v40  ;;  %v482_v40 = vrot.slane %v477_v39, %v1335_v45 }
  0x99   :  { %462 = vmatprep.subr.bf16.mxu0 %v1004_v41  ;;  %v486_v41 = vrot.slane %v477_v39, %v1340_v47 }
  0x9c   :  { %463 = vmatpush1.bf16.msra.mxu0 %v1002_v42 }
 0x132   :  { %v152_v34 = vpop.f32.mrb[0].mxu0 }
 0x133   :  { %v935_v35 = vpop.f32.mrb[1].mxu0 }
 0x134   :  { %v155_v36 = vpop.f32.mrb[2].mxu0  ;;  %v1049_v35 = vld [vmem:[#allocation11 + $0xe4] ss:$8 sps:$4 sm:$0xff]  }
 0x135   :  { %v159_v37 = vpack.c.bf16 %v155_v36, %v152_v34  ;;  %v936_v38 = vpop.f32.mrb[3].mxu0  ;;  %v1044_v34 = vld [vmem:[#allocation11 + $0xd0] ss:$8 sps:$4 sm:$0xff]   ;;  %v1047_v36 = vld [vmem:[#allocation11 + $0xe0] ss:$8 sps:$4 sm:$0xff]  }
 0x136   :  { %v1050_v38 = vld [vmem:[#allocation11 + $0xf0] ss:$8 sps:$4 sm:$0xff]  }
 0x137   :  { %862 = vmatmul.mubr.msk.bf16.vlgmr.msra.gmra.mrb[0].mxu1 %vm114_vm1, %v159_v37  ;;  %v1052_v37 = vld [vmem:[#allocation11 + $0xf4] ss:$8 sps:$4 sm:$0xff]  }
 0x138   :  { %521 = vmatprep.mubr.bf16.mxu1 %v1204_v5 }
 0x20a   :  { %v221_v50 = vpop.f32.mrb[0].mxu1 }
 0x20b   :  { %v222_v51 = vadd.f32 %v221_v50, %v167_v48  ;;  %v223_v52 = vpop.f32.mrb[1].mxu1 }
 0x20c   :  { %v224_v53 = vadd.f32 %v223_v52, %v171_v49  ;;  %v225_v54 = vpop.f32.mrb[2].mxu1 }
 0x20d   :  { %v226_v55 = vadd.f32 %v225_v54, %v167_v48  ;;  %v227_v56 = vpop.f32.mrb[3].mxu1  ;;  %v230_v58 = vmax.f32 %v222_v51, 0.0 }
 0x20e   :  { %v228_v57 = vadd.f32 %v227_v56, %v171_v49  ;;  %v231_v60 = vmax.f32 %v224_v53, 0.0 }
 0x20f   :  { %v232_v59 = vmax.f32 %v226_v55, 0.0 }
 0x210   :  { %v233_v61 = vmax.f32 %v228_v57, 0.0 }
 0x211   :  { %v234_v62 = vpack.c.bf16 %v232_v59, %v230_v58 }
 0x212   :  { %v235_v63 = vpack.c.bf16 %v233_v61, %v231_v60 }
 0x214   :  { %464 = vmatprep.mubr.bf16.mxu0 %v235_v63 }
 0x215   :  { %465 = vmatmul.mubr.bf16.vlgmr.msra.gmra.mrb[4].mxu0 %v234_v62 }
 0x216   :  { %823 = vmatprep.mubr.bf16.mxu0 %v1204_v5  ;;  %v1011_v5 = vld [vmem:[#allocation11 + $0x20] ss:$8 sps:$4 sm:$0xff]  }
 0x2e8   :  { %v466_v0 = vpop.f32.mrb[4].mxu0 }
 0x2e9   :  { %v468_v1 = vpop.f32.mrb[5].mxu0 }
 0x2ea   :  { %v470_v3 = vpop.f32.mrb[6].mxu0 }
 0x2eb   :  { %v475_v4 = vpack.c.bf16 %v470_v3, %v466_v0  ;;  %v472_v6 = vpop.f32.mrb[7].mxu0  ;;  %v779_v0 = vld [vmem:[%s1378_s7] sm:$0x3]  ;;  %s1163_s7 = scalar_lea.vmem %s844_s26, 512 }
 0x2ec   :  { %v476_v7 = vpack.c.bf16 %v472_v6, %v468_v1  ;;  %v784_v1 = vrot.slane %v779_v0, %v1335_v45  ;;  %v788_v3 = vrot.slane %v779_v0, %v1340_v47  ;;  %p1164_p12 = scmp.ne.s32.totalorder %s844_s26, %s1163_s7  ;;  %p1169_p0 = scmp.lt.s32.totalorder %s1163_s7, %s1163_s7 }
 0x2ee   :  { %489 = vmatprep.subr.bf16.mxu1 %v476_v7  ;;  %p1170_p1 = por %p1169_p0, %p1168_p13 }
 0x2ef   :  { %490 = vmatpush1.bf16.msra.mxu1 %v475_v4 }
 0x2f0   :  { %734 = vmatprep.subr.bf16.mxu1 %v1007_v8  ;;  %p1171_p2 = pnand %p1170_p1, %p1164_p12 }
 0x2f2   :  { %895 = vmatmul.mubr.msk.bf16.vlgmr.msra.gmra.mrb[4].mxu1 %vm114_vm1, %v1328_v2 }
 0x2f3   :  { %735 = vmatpush1.bf16.msra.mxu1 %v1005_v9 }
 0x2f4   :  { %736 = vmatprep.subr.bf16.mxu1 %v1010_v10 }
 0x2f7   :  { %737 = vmatpush1.bf16.msra.mxu1 %v1008_v11 }
 0x2f8   :  { %738 = vmatprep.subr.bf16.mxu1 %v1013_v12 }
 0x2fb   :  { %739 = vmatpush1.bf16.msra.mxu1 %v1011_v5 }
 0x2fc   :  { %740 = vmatprep.subr.bf16.mxu1 %v1016_v13 }
 0x2ff   :  { %741 = vmatpush1.bf16.msra.mxu1 %v1014_v14 }
 0x300   :  { %742 = vmatprep.subr.bf16.mxu1 %v1019_v15 }
 0x303   :  { %743 = vmatpush1.bf16.msra.mxu1 %v1017_v16 }
 0x304   :  { %744 = vmatprep.subr.bf16.mxu1 %v1022_v17 }
 0x307   :  { %745 = vmatpush1.bf16.msra.mxu1 %v1020_v18 }
 0x308   :  { %746 = vmatprep.subr.bf16.mxu1 %v1025_v19 }
 0x30b   :  { %747 = vmatpush1.bf16.msra.mxu1 %v1023_v20 }
 0x30c   :  { %748 = vmatprep.subr.bf16.mxu1 %v1028_v21 }
 0x30f   :  { %749 = vmatpush1.bf16.msra.mxu1 %v1026_v22 }
 0x310   :  { %750 = vmatprep.subr.bf16.mxu1 %v1031_v23 }
 0x313   :  { %751 = vmatpush1.bf16.msra.mxu1 %v1029_v24 }
 0x314   :  { %752 = vmatprep.subr.bf16.mxu1 %v1034_v25 }
 0x317   :  { %753 = vmatpush1.bf16.msra.mxu1 %v1032_v26 }
 0x318   :  { %754 = vmatprep.subr.bf16.mxu1 %v1037_v27 }
 0x31b   :  { %755 = vmatpush1.bf16.msra.mxu1 %v1035_v28 }
 0x31c   :  { %756 = vmatprep.subr.bf16.mxu1 %v1040_v29 }
 0x31f   :  { %757 = vmatpush1.bf16.msra.mxu1 %v1038_v30 }
 0x320   :  { %758 = vmatprep.subr.bf16.mxu1 %v1043_v31 }
 0x323   :  { %759 = vmatpush1.bf16.msra.mxu1 %v1041_v32 }
 0x324   :  { %760 = vmatprep.subr.bf16.mxu1 %v1046_v33 }
 0x327   :  { %761 = vmatpush1.bf16.msra.mxu1 %v1044_v34 }
 0x328   :  { %762 = vmatprep.subr.bf16.mxu1 %v1049_v35 }
 0x32b   :  { %763 = vmatpush1.bf16.msra.mxu1 %v1047_v36 }
 0x32c   :  { %764 = vmatprep.subr.bf16.mxu1 %v1052_v37 }
 0x32f   :  { %765 = vmatpush1.bf16.msra.mxu1 %v1050_v38 }
 0x3c5   :  { %v523_v42 = vpop.f32.mrb[4].mxu1 }
 0x3c6   :  { %v524_v43 = vadd.f32 %v523_v42, %v482_v40  ;;  %v525_v44 = vpop.f32.mrb[5].mxu1 }
 0x3c7   :  { %v526_v46 = vadd.f32 %v525_v44, %v486_v41  ;;  %v527_v48 = vpop.f32.mrb[6].mxu1 }
 0x3c8   :  { %v528_v49 = vadd.f32 %v527_v48, %v482_v40  ;;  %v529_v50 = vpop.f32.mrb[7].mxu1  ;;  %v532_v52 = vmax.f32 %v524_v43, 0.0 }
 0x3c9   :  { %v530_v51 = vadd.f32 %v529_v50, %v486_v41  ;;  %v533_v54 = vmax.f32 %v526_v46, 0.0 }
 0x3ca   :  { %v534_v53 = vmax.f32 %v528_v49, 0.0 }
 0x3cb   :  { %v535_v55 = vmax.f32 %v530_v51, 0.0 }
 0x3cc   :  { %v536_v56 = vpack.c.bf16 %v534_v53, %v532_v52 }
 0x3cd   :  { %v537_v57 = vpack.c.bf16 %v535_v55, %v533_v54 }
 0x3cf   :  { %766 = vmatprep.mubr.bf16.mxu1 %v537_v57 }
 0x3d0   :  { %767 = vmatmul.mubr.bf16.vlgmr.msra.gmra.mrb[8].mxu1 %v536_v56 }
 0x4a3   :  { %v768_v58 = vpop.f32.mrb[8].mxu1 }
 0x4a4   :  { %v770_v59 = vpop.f32.mrb[9].mxu1 }
 0x4a5   :  { %v772_v60 = vpop.f32.mrb[10].mxu1 }
 0x4a6   :  { %v777_v61 = vpack.c.bf16 %v772_v60, %v768_v58  ;;  %v774_v62 = vpop.f32.mrb[11].mxu1 }
 0x4a7   :  { %v778_v63 = vpack.c.bf16 %v774_v62, %v770_v59 }
 0x4a9   :  { %791 = vmatprep.subr.bf16.mxu0 %v778_v63 }
 0x4aa   :  { %792 = vmatpush1.bf16.msra.mxu0 %v777_v61 }
 0x4ad   :  { %928 = vmatmul.mubr.msk.bf16.vlgmr.msra.gmra.mrb[8].mxu0 %vm114_vm1, %v1328_v2 }
 0x580   :  { %v825_v4 = vpop.f32.mrb[8].mxu0 }
 0x581   :  { %v826_v6 = vadd.f32 %v825_v4, %v784_v1  ;;  %v827_v7 = vpop.f32.mrb[9].mxu0 }
 0x582   :  { %v828_v8 = vadd.f32 %v827_v7, %v788_v3  ;;  %v829_v9 = vpop.f32.mrb[10].mxu0 }
 0x583   :  { %834 = vst [vmem:[#allocation12] sm:$0xff] %v826_v6  ;;  %v830_v10 = vadd.f32 %v829_v9, %v784_v1  ;;  %v831_v11 = vpop.f32.mrb[11].mxu0 }
 0x584   :  { %835 = vst [vmem:[#allocation12 + $0x8] sm:$0xff] %v828_v8  ;;  %v832_v2 = vadd.f32 %v831_v11, %v788_v3 }
 0x585   :  { %836 = vst [vmem:[#allocation12 + $0x10] sm:$0xff] %v830_v10 }
 0x586   :  { %837 = vst [vmem:[#allocation12 + $0x18] sm:$0xff] %v832_v2 }
 0x587   :  { %1174 = shalt.err (!%p1171_p2)
}
 0x588   :  { %s1175_s30 = scalar_lea.hbm %s1379_s8, 512 }
 0x589   :  { %p1176_p3 = scmp.ne.s32.totalorder %s1379_s8, %s1175_s30  ;;  %p1179_p4 = scmp.lt.u32.totalorder %s1175_s30, %s1379_s8 }
 0x58b   :  { %p1181_p5 = pnand %p1179_p4, %p1176_p3 }
 0x58d   :  { %1184 = shalt.err (!%p1181_p5)
}
 0x58e   :  { %s1206_s13 = smov 256   ;;  %s1207_s0 = smov 16  }
 0x58f   :  { %849 = dma.vmem_to_hbm [thread:$0]  %s844_s26, 512, %s1379_s8, [#allocation5], %s1206_s13, %s1206_s13, %s1207_s0  }
 0x590   :  { %1191 = dma.done.wait [#allocation5], 512  }
 0x591   :  { %1192 = vsyncadd [#allocation5], 4294966784 }
 0x592   :  { %853 = vsyncpa [#allocation4], 1 }
 0x593   :  { %854 = vsyncpa [#allocation7], 1 }
 0x594   :  { %855 = vsyncpa [#allocation10], 1 }
 0x595   :  { %856 = vsyncpa [#allocation5], 1 }

</bundles_post_ra>
